<compile_context>
chip_gen: v7x
topology: tpu7x:2x2x1
jax: 0.10.0
libtpu: 0.0.40
codegen_flags: <defaults>
</compile_context>

<pallas_src>
import functools

import jax
import jax.numpy as jnp
from jax.experimental import pallas as pl
from jax.experimental.pallas import tpu as pltpu

LANE = 128      # lane width: pad feature dims to multiples of this
SUBLANE = 8     # f32 sublane; streamed x/out tiles are f32 (use 16 if bf16 streams)
TB_CAP = 4096   # hard cap on the batch tile


# ---------------------------------------------------------------------------
# Activation (shared by the kernel and the pure-JAX reference).
# ---------------------------------------------------------------------------
def _apply_act(x, act):
    if act == "relu":
        return jnp.maximum(x, 0.0)
    if act == "leakyrelu":
        return jnp.where(x >= 0.0, x, 0.01 * x)  # PyTorch default slope
    if act == "tanh":
        return jnp.tanh(x)
    # GELU, tanh approximation (VPU + EUP tanh).
    # TODO(synk): PyTorch nn.GELU() defaults to the exact erf form; the tanh
    # approximation differs by <~1e-3 and is used here for guaranteed lowering.
    c = 0.7978845608028654  # sqrt(2 / pi)
    return 0.5 * x * (1.0 + jnp.tanh(c * (x + 0.044715 * x * x * x)))


def _round_up(n, m):
    return ((n + m - 1) // m) * m


# ---------------------------------------------------------------------------
# Generation-aware VMEM budget.
# ---------------------------------------------------------------------------
def _vmem_caps():
    """Returns (tile_budget_bytes, vmem_limit_bytes)."""
    try:
        cap = int(pltpu.get_tpu_info().vmem_capacity_bytes)
    except Exception:
        cap = 0
    if cap <= 0:
        cap = 64 * 1024 * 1024          # safe fallback: v7x size, fits v5e/v6e too
    cap = min(cap, 128 * 1024 * 1024)
    return (cap * 7) // 10, (cap * 85) // 100


# ---------------------------------------------------------------------------
# Fused kernel: loop over a group of layers with all weights resident in VMEM.
# Intermediate activations stay in vregs/VMEM (never written back to HBM).
# ---------------------------------------------------------------------------
def _mlp_group_kernel(*refs, n_layers, act):
    # refs = (x_ref, w0, b0, w1, b1, ..., w_{n-1}, b_{n-1}, o_ref)
    x_ref = refs[0]
    o_ref = refs[1 + 2 * n_layers]
    h = x_ref[...]                                   # (TB, d0_pad) f32
    for i in range(n_layers):
        w_ref = refs[1 + 2 * i]                      # (din_pad, dout_pad) bf16
        b_ref = refs[2 + 2 * i]                      # (1, dout_pad) f32
        acc = jnp.dot(h.astype(w_ref.dtype), w_ref[...],
                      preferred_element_type=jnp.float32)
        acc = acc + b_ref[...]
        h = _apply_act(acc, act)                     # f32
    o_ref[...] = h.astype(o_ref.dtype)


# ---------------------------------------------------------------------------
# Parameter preparation (hoisted out of the hot path, done once).
# ---------------------------------------------------------------------------
def init_mlp_params(architecture, key):
    """Mimic nn.Linear default init: U(-1/sqrt(fan_in), 1/sqrt(fan_in))."""
    params = []
    for (d_in, d_out) in architecture:
        key, kw, kb = jax.random.split(key, 3)
        bound = 1.0 / (d_in ** 0.5)
        w = jax.random.uniform(kw, (d_out, d_in), jnp.float32, -bound, bound)
        b = jax.random.uniform(kb, (d_out,), jnp.float32, -bound, bound)
        params.append((w, b))
    return params


def prepare_params(params, compute_dtype=jnp.bfloat16):
    """Pre-transpose to (d_in, d_out), zero-pad feature dims to LANE multiples
    (lane-dense tiles, no masked stores; padded columns stay exactly 0 through
    every layer since act(0)=0), and cast weights to bf16 once."""
    prepared = []
    for w, b in params:
        d_out, d_in = w.shape
        d_in_p = _round_up(d_in, LANE)
        d_out_p = _round_up(d_out, LANE)
        w_t = jnp.pad(w.T, ((0, d_in_p - d_in), (0, d_out_p - d_out)))
        b_p = jnp.pad(b, (0, d_out_p - d_out)).reshape(1, d_out_p)
        prepared.append((w_t.astype(compute_dtype), b_p.astype(jnp.float32),
                         d_in, d_out))
    return prepared


# ---------------------------------------------------------------------------
# VMEM accounting: group layers so resident weights fit, pick the batch tile.
# ---------------------------------------------------------------------------
def _resident_bytes(group):
    n = 0
    for w_t, b_p, _, _ in group:
        n += w_t.size * w_t.dtype.itemsize + b_p.size * b_p.dtype.itemsize
    return n


def _split_groups(prepared, budget):
    """Greedy grouping: each group's resident (pipeline double-buffered) weights
    use at most ~half the tile budget, leaving room for the batch tile."""
    weight_budget = budget // 2
    groups, cur = [], []
    for layer in prepared:
        cand = cur + [layer]
        if cur and 2 * _resident_bytes(cand) > weight_budget:
            groups.append(cur)
            cur = [layer]
        else:
            cur = cand
    groups.append(cur)
    # TODO(synk): a single layer whose weight alone exceeds the budget needs
    # K/N grid tiling with an f32 accumulator scratch (pl.when init/finalize).
    return groups


def _pick_batch_tile(batch, groups, budget):
    """Largest batch tile (multiple of 8, capped at TB_CAP) fitting the budget;
    keeps >=2 grid steps when the batch allows so v7x can use both TCs."""
    resident = max(2 * _resident_bytes(g) for g in groups)
    # TODO(synk): pipeline_mode=pl.Buffered(1) on the constant weight/bias specs
    # would drop the factor 2 above and reclaim VMEM (most useful on v7x).
    d_max = max(max(w.shape) for g in groups for (w, _, _, _) in g)
    per_row = 8 * 4 * d_max              # dbl-buffered f32 x/out rows + live intermediates
    avail = budget - resident
    tb_max = max(SUBLANE, avail // per_row) if avail > 0 else SUBLANE
    tb = int(min(TB_CAP, tb_max))
    tb = max(SUBLANE, (tb // SUBLANE) * SUBLANE)

    bp = _round_up(max(batch, 1), SUBLANE)
    if tb >= bp:
        if bp >= 2 * SUBLANE:
            tb = _round_up(pl.cdiv(bp, 2), SUBLANE)   # >=2 steps for v7x megacore
        else:
            tb = bp
    bp = _round_up(bp, tb)
    return tb, bp


# ---------------------------------------------------------------------------
# One fused pallas_call over a group of layers.
# ---------------------------------------------------------------------------
def _mlp_group_call(xp, group, act, tb, vmem_limit):
    bp, d_in_p = xp.shape
    n_layers = len(group)
    d_out_p = group[-1][0].shape[1]

    in_specs = [pl.BlockSpec((tb, d_in_p), lambda i: (i, 0))]   # streamed x tile
    args = [xp]
    flops = 0
    dot_out_elems = 0
    bytes_accessed = 4 * bp * d_in_p + 4 * bp * d_out_p
    for (w_t, b_p, _, _) in group:
        in_specs.append(pl.BlockSpec(w_t.shape, lambda i: (0, 0)))   # resident weight
        in_specs.append(pl.BlockSpec(b_p.shape, lambda i: (0, 0)))   # resident bias
        args.extend([w_t, b_p])
        flops += 2 * bp * w_t.shape[0] * w_t.shape[1]
        dot_out_elems += bp * w_t.shape[1]
        bytes_accessed += (w_t.size * w_t.dtype.itemsize
                           + b_p.size * b_p.dtype.itemsize)
    transcendentals = dot_out_elems if act in ("gelu", "tanh") else 0

    return pl.pallas_call(
        functools.partial(_mlp_group_kernel, n_layers=n_layers, act=act),
        out_shape=jax.ShapeDtypeStruct((bp, d_out_p), jnp.float32),
        grid_spec=pltpu.PrefetchScalarGridSpec(
            num_scalar_prefetch=0,
            grid=(bp // tb,),
            in_specs=in_specs,
            out_specs=pl.BlockSpec((tb, d_out_p), lambda i: (i, 0)),
        ),
        compiler_params=pltpu.CompilerParams(
            dimension_semantics=("parallel",),     # independent batch tiles
            vmem_limit_bytes=int(vmem_limit),
        ),
        cost_estimate=pl.CostEstimate(
            flops=int(flops),
            transcendentals=int(transcendentals),
            bytes_accessed=int(bytes_accessed),
        ),
    )(*args)


# ---------------------------------------------------------------------------
# MLP forward (Pallas) and pure-JAX reference.
# ---------------------------------------------------------------------------
def mlp_forward(x, prepared, act="gelu"):
    # Dropout with the module's default p=0.0 is the identity.
    # TODO(synk): training-mode dropout (p>0) would need pltpu.prng_* in-kernel.
    batch, d_in = x.shape
    d_in_p = prepared[0][0].shape[0]
    d_out_true = prepared[-1][3]

    budget, vmem_limit = _vmem_caps()
    groups = _split_groups(prepared, budget)
    tb, bp = _pick_batch_tile(batch, groups, budget)

    # Pad batch + input features ONCE (hoisted out of the layer loop).
    xp = jnp.pad(x.astype(jnp.float32),
                 ((0, bp - batch), (0, d_in_p - d_in)))

    h = xp
    for g in groups:
        h = _mlp_group_call(h, g, act, tb, vmem_limit)
    return h[:batch, :d_out_true]


def mlp_reference(x, params, act="gelu"):
    # Mirrors the kernel's numerics: bf16 operands, f32 accumulation.
    out = x.astype(jnp.float32)
    for w, b in params:
        out = jnp.dot(out.astype(jnp.bfloat16), w.T.astype(jnp.bfloat16),
                      preferred_element_type=jnp.float32) + b
        out = _apply_act(out, act)
    return out


if __name__ == "__main__":
    key = jax.random.PRNGKey(0)
    k_params, k_x = jax.random.split(key)

    # Small MLP consistent with the module: architecture = [(32,64),(64,64),(64,16)]
    architecture = [(32, 64), (64, 64), (64, 16)]
    batch = 8
    act = "gelu"  # module default

    params = init_mlp_params(architecture, k_params)
    prepared = prepare_params(params)

    x = jax.random.normal(k_x, (batch, architecture[0][0]), dtype=jnp.float32)

    out = mlp_forward(x, prepared, act=act)
    out = jax.block_until_ready(out)

    ref = mlp_reference(x, params, act=act)
    assert out.shape == (batch, architecture[-1][1])
    max_err = float(jnp.max(jnp.abs(out - ref)))
    assert jnp.allclose(out, ref, atol=2e-3, rtol=2e-3), max_err

    print("KERNEL_OK")
</pallas_src>

<mosaic_0001>
module attributes {stable_mosaic.version = 11 : i64} {
  func.func @_mlp_group_kernel(%arg0: i32, %arg1: memref<8x128xf32, #tpu.memory_space<vmem>>, %arg2: memref<128x128xbf16, #tpu.memory_space<vmem>>, %arg3: memref<1x128xf32, #tpu.memory_space<vmem>>, %arg4: memref<128x128xbf16, #tpu.memory_space<vmem>>, %arg5: memref<1x128xf32, #tpu.memory_space<vmem>>, %arg6: memref<128x128xbf16, #tpu.memory_space<vmem>>, %arg7: memref<1x128xf32, #tpu.memory_space<vmem>>, %arg8: memref<8x128xf32, #tpu.memory_space<vmem>>) attributes {dimension_semantics = [#tpu.dimension_semantics<parallel>], iteration_bounds = array<i64: 1>, scalar_prefetch = 0 : i64, scratch_operands = 0 : i64, tpu.core_type = #tpu.core_type<tc>, window_params = [{transform_indices = @transform_0, window_bounds = array<i64: 8, 128>}, {pipeline_mode = #tpu.pipeline_mode<synchronous>, transform_indices = @transform_1, window_bounds = array<i64: 128, 128>}, {pipeline_mode = #tpu.pipeline_mode<synchronous>, transform_indices = @transform_2, window_bounds = array<i64: 1, 128>}, {pipeline_mode = #tpu.pipeline_mode<synchronous>, transform_indices = @transform_3, window_bounds = array<i64: 128, 128>}, {pipeline_mode = #tpu.pipeline_mode<synchronous>, transform_indices = @transform_4, window_bounds = array<i64: 1, 128>}, {pipeline_mode = #tpu.pipeline_mode<synchronous>, transform_indices = @transform_5, window_bounds = array<i64: 128, 128>}, {pipeline_mode = #tpu.pipeline_mode<synchronous>, transform_indices = @transform_6, window_bounds = array<i64: 1, 128>}, {transform_indices = @transform_7, window_bounds = array<i64: 8, 128>}]} {
    %c0 = arith.constant 0 : index
    %c0_0 = arith.constant 0 : index
    %0 = vector.load %arg1[%c0, %c0_0] : memref<8x128xf32, #tpu.memory_space<vmem>>, vector<8x128xf32>
    %1 = arith.truncf %0 : vector<8x128xf32> to vector<8x128xbf16>
    %c0_1 = arith.constant 0 : index
    %c0_2 = arith.constant 0 : index
    %2 = vector.load %arg2[%c0_1, %c0_2] : memref<128x128xbf16, #tpu.memory_space<vmem>>, vector<128x128xbf16>
    %cst = arith.constant dense<0.000000e+00> : vector<8x128xf32>
    %3 = tpu.matmul %1, %2, %cst {dimension_numbers = #tpu.dot_dimension_numbers<[1], [0], [0], [1], [0, 0, 1, 1], [], []>} : vector<8x128xbf16>, vector<128x128xbf16>, vector<8x128xf32> -> vector<8x128xf32>
    %c0_3 = arith.constant 0 : index
    %c0_4 = arith.constant 0 : index
    %4 = vector.load %arg3[%c0_3, %c0_4] : memref<1x128xf32, #tpu.memory_space<vmem>>, vector<1x128xf32>
    %5 = vector.broadcast %4 : vector<1x128xf32> to vector<8x128xf32>
    %6 = arith.addf %3, %5 : vector<8x128xf32>
    %cst_5 = arith.constant 5.000000e-01 : f32
    %7 = vector.broadcast %cst_5 : f32 to vector<8x128xf32>
    %8 = arith.mulf %7, %6 : vector<8x128xf32>
    %cst_6 = arith.constant 4.471500e-02 : f32
    %9 = vector.broadcast %cst_6 : f32 to vector<8x128xf32>
    %10 = arith.mulf %9, %6 : vector<8x128xf32>
    %11 = arith.mulf %10, %6 : vector<8x128xf32>
    %12 = arith.mulf %11, %6 : vector<8x128xf32>
    %13 = arith.addf %6, %12 : vector<8x128xf32>
    %cst_7 = arith.constant 0.797884583 : f32
    %14 = vector.broadcast %cst_7 : f32 to vector<8x128xf32>
    %15 = arith.mulf %14, %13 : vector<8x128xf32>
    %16 = math.tanh %15 : vector<8x128xf32>
    %cst_8 = arith.constant 1.000000e+00 : f32
    %17 = vector.broadcast %cst_8 : f32 to vector<8x128xf32>
    %18 = arith.addf %17, %16 : vector<8x128xf32>
    %19 = arith.mulf %8, %18 : vector<8x128xf32>
    %20 = arith.truncf %19 : vector<8x128xf32> to vector<8x128xbf16>
    %c0_9 = arith.constant 0 : index
    %c0_10 = arith.constant 0 : index
    %21 = vector.load %arg4[%c0_9, %c0_10] : memref<128x128xbf16, #tpu.memory_space<vmem>>, vector<128x128xbf16>
    %cst_11 = arith.constant dense<0.000000e+00> : vector<8x128xf32>
    %22 = tpu.matmul %20, %21, %cst_11 {dimension_numbers = #tpu.dot_dimension_numbers<[1], [0], [0], [1], [0, 0, 1, 1], [], []>} : vector<8x128xbf16>, vector<128x128xbf16>, vector<8x128xf32> -> vector<8x128xf32>
    %c0_12 = arith.constant 0 : index
    %c0_13 = arith.constant 0 : index
    %23 = vector.load %arg5[%c0_12, %c0_13] : memref<1x128xf32, #tpu.memory_space<vmem>>, vector<1x128xf32>
    %24 = vector.broadcast %23 : vector<1x128xf32> to vector<8x128xf32>
    %25 = arith.addf %22, %24 : vector<8x128xf32>
    %cst_14 = arith.constant 5.000000e-01 : f32
    %26 = vector.broadcast %cst_14 : f32 to vector<8x128xf32>
    %27 = arith.mulf %26, %25 : vector<8x128xf32>
    %cst_15 = arith.constant 4.471500e-02 : f32
    %28 = vector.broadcast %cst_15 : f32 to vector<8x128xf32>
    %29 = arith.mulf %28, %25 : vector<8x128xf32>
    %30 = arith.mulf %29, %25 : vector<8x128xf32>
    %31 = arith.mulf %30, %25 : vector<8x128xf32>
    %32 = arith.addf %25, %31 : vector<8x128xf32>
    %cst_16 = arith.constant 0.797884583 : f32
    %33 = vector.broadcast %cst_16 : f32 to vector<8x128xf32>
    %34 = arith.mulf %33, %32 : vector<8x128xf32>
    %35 = math.tanh %34 : vector<8x128xf32>
    %cst_17 = arith.constant 1.000000e+00 : f32
    %36 = vector.broadcast %cst_17 : f32 to vector<8x128xf32>
    %37 = arith.addf %36, %35 : vector<8x128xf32>
    %38 = arith.mulf %27, %37 : vector<8x128xf32>
    %39 = arith.truncf %38 : vector<8x128xf32> to vector<8x128xbf16>
    %c0_18 = arith.constant 0 : index
    %c0_19 = arith.constant 0 : index
    %40 = vector.load %arg6[%c0_18, %c0_19] : memref<128x128xbf16, #tpu.memory_space<vmem>>, vector<128x128xbf16>
    %cst_20 = arith.constant dense<0.000000e+00> : vector<8x128xf32>
    %41 = tpu.matmul %39, %40, %cst_20 {dimension_numbers = #tpu.dot_dimension_numbers<[1], [0], [0], [1], [0, 0, 1, 1], [], []>} : vector<8x128xbf16>, vector<128x128xbf16>, vector<8x128xf32> -> vector<8x128xf32>
    %c0_21 = arith.constant 0 : index
    %c0_22 = arith.constant 0 : index
    %42 = vector.load %arg7[%c0_21, %c0_22] : memref<1x128xf32, #tpu.memory_space<vmem>>, vector<1x128xf32>
    %43 = vector.broadcast %42 : vector<1x128xf32> to vector<8x128xf32>
    %44 = arith.addf %41, %43 : vector<8x128xf32>
    %cst_23 = arith.constant 5.000000e-01 : f32
    %45 = vector.broadcast %cst_23 : f32 to vector<8x128xf32>
    %46 = arith.mulf %45, %44 : vector<8x128xf32>
    %cst_24 = arith.constant 4.471500e-02 : f32
    %47 = vector.broadcast %cst_24 : f32 to vector<8x128xf32>
    %48 = arith.mulf %47, %44 : vector<8x128xf32>
    %49 = arith.mulf %48, %44 : vector<8x128xf32>
    %50 = arith.mulf %49, %44 : vector<8x128xf32>
    %51 = arith.addf %44, %50 : vector<8x128xf32>
    %cst_25 = arith.constant 0.797884583 : f32
    %52 = vector.broadcast %cst_25 : f32 to vector<8x128xf32>
    %53 = arith.mulf %52, %51 : vector<8x128xf32>
    %54 = math.tanh %53 : vector<8x128xf32>
    %cst_26 = arith.constant 1.000000e+00 : f32
    %55 = vector.broadcast %cst_26 : f32 to vector<8x128xf32>
    %56 = arith.addf %55, %54 : vector<8x128xf32>
    %57 = arith.mulf %46, %56 : vector<8x128xf32>
    %c0_27 = arith.constant 0 : index
    %c0_28 = arith.constant 0 : index
    %58 = vector.load %arg8[%c0_27, %c0_28] : memref<8x128xf32, #tpu.memory_space<vmem>>, vector<8x128xf32>
    tpu.vector_store %arg8[%c0_27, %c0_28], %57 {strides = array<i32>} : memref<8x128xf32, #tpu.memory_space<vmem>>, vector<8x128xf32>,
    return
  }
  func.func @transform_0(%arg0: i32) -> (i32, i32) {
    %c0_i32 = arith.constant 0 : i32
    %c0_i32_0 = arith.constant 0 : i32
    return %arg0, %c0_i32 : i32, i32
  }
  func.func @transform_1(%arg0: i32) -> (i32, i32) {
    %c0_i32 = arith.constant 0 : i32
    %c0_i32_0 = arith.constant 0 : i32
    %c0_i32_1 = arith.constant 0 : i32
    return %c0_i32, %c0_i32_0 : i32, i32
  }
  func.func @transform_2(%arg0: i32) -> (i32, i32) {
    %c0_i32 = arith.constant 0 : i32
    %c0_i32_0 = arith.constant 0 : i32
    %c0_i32_1 = arith.constant 0 : i32
    return %c0_i32, %c0_i32_0 : i32, i32
  }
  func.func @transform_3(%arg0: i32) -> (i32, i32) {
    %c0_i32 = arith.constant 0 : i32
    %c0_i32_0 = arith.constant 0 : i32
    %c0_i32_1 = arith.constant 0 : i32
    return %c0_i32, %c0_i32_0 : i32, i32
  }
  func.func @transform_4(%arg0: i32) -> (i32, i32) {
    %c0_i32 = arith.constant 0 : i32
    %c0_i32_0 = arith.constant 0 : i32
    %c0_i32_1 = arith.constant 0 : i32
    return %c0_i32, %c0_i32_0 : i32, i32
  }
  func.func @transform_5(%arg0: i32) -> (i32, i32) {
    %c0_i32 = arith.constant 0 : i32
    %c0_i32_0 = arith.constant 0 : i32
    %c0_i32_1 = arith.constant 0 : i32
    return %c0_i32, %c0_i32_0 : i32, i32
  }
  func.func @transform_6(%arg0: i32) -> (i32, i32) {
    %c0_i32 = arith.constant 0 : i32
    %c0_i32_0 = arith.constant 0 : i32
    %c0_i32_1 = arith.constant 0 : i32
    return %c0_i32, %c0_i32_0 : i32, i32
  }
  func.func @transform_7(%arg0: i32) -> (i32, i32) {
    %c0_i32 = arith.constant 0 : i32
    %c0_i32_0 = arith.constant 0 : i32
    return %arg0, %c0_i32 : i32, i32
  }
}

</mosaic_0001>

<bundles_post_ra>
// kernel: tpu_custom_call.1
= control target key start
LH: loop header
LB: loop body
LE: loop exit
PB: predicated region body
PF: predicated region fallthrough
CT: control target
= control target key end

     0   :  { %12 = vsyncpa [#allocation3], 0  ;;  %s891_s0 = inlined_call_operand.hbm [shape: f32[8,128], index: 0, kind: input, shape index: {}]   ;;  %s892_s1 = inlined_call_operand.hbm [shape: bf16[128,128], index: 1, kind: input, shape index: {}]   ;;  %s893_s2 = inlined_call_operand.vmem [shape: f32[1,128], index: 2, kind: input, shape index: {}]   ;;  %s894_s3 = inlined_call_operand.hbm [shape: bf16[128,128], index: 3, kind: input, shape index: {}]   ;;  %s895_s4 = inlined_call_operand.vmem [shape: f32[1,128], index: 4, kind: input, shape index: {}]   ;;  %s896_s5 = inlined_call_operand.hbm [shape: bf16[128,128], index: 5, kind: input, shape index: {}]   ;;  %s897_s6 = inlined_call_operand.vmem [shape: f32[1,128], index: 6, kind: input, shape index: {}]   ;;  %s898_s7 = inlined_call_operand.hbm [shape: f32[8,128], index: 7, kind: output, shape index: {}]  }
   0x1   :  { %13 = vsyncpa [#allocation6], 0 }
   0x2   :  { %14 = vsyncpa [#allocation9], 0 }
   0x3   :  { %15 = vsyncpa [#allocation4], 0  ;;  %s734_s24 = smov [#allocation5]   ;;  %s616_s28 = scalar_lea.hbm %s892_s1, 1024 }
   0x4   :  { %s31_s25 = sshll.u32 %s734_s24, 4  ;;  %p617_p0 = scmp.ne.s32.totalorder %s892_s1, %s616_s28  ;;  %s32_s25 = int_to_ptr.vmem [resolvable:$true] %s31_s25 }
   0x5   :  { %p620_p1 = scmp.lt.u32.totalorder %s616_s28, %s892_s1 }
   0x7   :  { %p622_p2 = pnand %p620_p1, %p617_p0 }
   0x9   :  { %625 = shalt.err (!%p622_p2)
}
   0xa   :  { %s626_s10 = scalar_lea.vmem %s32_s25, 1024  ;;  %p631_p4 = scmp.lt.s32.totalorder %s32_s25, %s32_s25 }
   0xb   :  { %p627_p3 = scmp.ne.s32.totalorder %s32_s25, %s626_s10  ;;  %p632_p5 = scmp.lt.s32.totalorder %s626_s10, %s626_s10 }
   0xd   :  { %p633_p6 = por %p632_p5, %p631_p4 }
   0xf   :  { %p634_p7 = pnand %p633_p6, %p627_p3 }
  0x11   :  { %637 = shalt.err (!%p634_p7)
}
  0x12   :  { %s735_s11 = smov 64   ;;  %s736_s12 = smov 4  }
  0x13   :  { %37 = dma.hbm_to_vmem [thread:$0]  %s892_s1, 1024, %s32_s25, [#allocation6], %s735_s11, %s735_s11, %s736_s12  }
  0x14   :  { %s737_s15 = smov [#allocation2]   ;;  %s738_s17 = smov [#allocation7]  }
  0x15   :  { %s22_s16 = sshll.u32 %s737_s15, 4  ;;  %s45_s18 = sshll.u32 %s738_s17, 4  ;;  %s23_s16 = int_to_ptr.vmem [resolvable:$true] %s22_s16  ;;  %s46_s18 = int_to_ptr.vmem [resolvable:$true] %s45_s18 }
  0x16   :  { %s638_s21 = scalar_lea.hbm %s891_s0, 128 }
  0x17   :  { %p639_p8 = scmp.ne.s32.totalorder %s891_s0, %s638_s21  ;;  %p642_p9 = scmp.lt.u32.totalorder %s638_s21, %s891_s0 }
  0x19   :  { %p644_p10 = pnand %p642_p9, %p639_p8 }
  0x1b   :  { %647 = shalt.err (!%p644_p10)
}
  0x1c   :  { %s648_s1 = scalar_lea.vmem %s23_s16, 128  ;;  %p653_p12 = scmp.lt.s32.totalorder %s23_s16, %s23_s16 }
  0x1d   :  { %p649_p11 = scmp.ne.s32.totalorder %s23_s16, %s648_s1  ;;  %p654_p13 = scmp.lt.s32.totalorder %s648_s1, %s648_s1 }
  0x1f   :  { %p655_p0 = por %p654_p13, %p653_p12 }
  0x21   :  { %p656_p1 = pnand %p655_p0, %p649_p11 }
  0x23   :  { %659 = shalt.err (!%p656_p1)
}
  0x24   :  { %25 = dma.hbm_to_vmem [thread:$0]  %s891_s0, 128, %s23_s16, [#allocation3]  }
  0x25   :  { %s660_s30 = scalar_lea.hbm %s894_s3, 1024 }
  0x26   :  { %p661_p2 = scmp.ne.s32.totalorder %s894_s3, %s660_s30  ;;  %p664_p3 = scmp.lt.u32.totalorder %s660_s30, %s894_s3 }
  0x28   :  { %p666_p4 = pnand %p664_p3, %p661_p2 }
  0x2a   :  { %669 = shalt.err (!%p666_p4)
}
  0x2b   :  { %s670_s14 = scalar_lea.vmem %s46_s18, 1024  ;;  %p675_p6 = scmp.lt.s32.totalorder %s46_s18, %s46_s18 }
  0x2c   :  { %p671_p5 = scmp.ne.s32.totalorder %s46_s18, %s670_s14  ;;  %p676_p7 = scmp.lt.s32.totalorder %s670_s14, %s670_s14 }
  0x2e   :  { %p677_p8 = por %p676_p7, %p675_p6 }
  0x30   :  { %p678_p9 = pnand %p677_p8, %p671_p5 }
  0x32   :  { %681 = shalt.err (!%p678_p9)
}
  0x33   :  { %51 = dma.hbm_to_vmem [thread:$0]  %s894_s3, 1024, %s46_s18, [#allocation6], %s735_s11, %s735_s11, %s736_s12  }
  0x34   :  { %s739_s16 = smov [#allocation8]   ;;  %s682_s21 = scalar_lea.hbm %s896_s5, 1024 }
  0x35   :  { %s59_s17 = sshll.u32 %s739_s16, 4  ;;  %p683_p10 = scmp.ne.s32.totalorder %s896_s5, %s682_s21  ;;  %s60_s17 = int_to_ptr.vmem [resolvable:$true] %s59_s17 }
  0x36   :  { %p686_p11 = scmp.lt.u32.totalorder %s682_s21, %s896_s5 }
  0x38   :  { %p688_p12 = pnand %p686_p11, %p683_p10 }
  0x3a   :  { %691 = shalt.err (!%p688_p12)
}
  0x3b   :  { %s692_s1 = scalar_lea.vmem %s60_s17, 1024  ;;  %p697_p0 = scmp.lt.s32.totalorder %s60_s17, %s60_s17 }
  0x3c   :  { %p693_p13 = scmp.ne.s32.totalorder %s60_s17, %s692_s1  ;;  %p698_p1 = scmp.lt.s32.totalorder %s692_s1, %s692_s1 }
  0x3e   :  { %p699_p2 = por %p698_p1, %p697_p0 }
  0x40   :  { %p700_p3 = pnand %p699_p2, %p693_p13 }
  0x42   :  { %703 = shalt.err (!%p700_p3)
}
  0x43   :  { %65 = dma.hbm_to_vmem [thread:$0]  %s896_s5, 1024, %s60_s17, [#allocation9], %s735_s11, %s735_s11, %s736_s12  }
  0x44   :  { %726 = dma.done.wait [#allocation3], 128  }
  0x45   :  { %727 = vsyncadd [#allocation3], 4294967168 }
  0x46   :  { %728 = dma.done.wait [#allocation6], 2048  }
  0x47   :  { %729 = vsyncadd [#allocation6], 4294965248 }
  0x48   :  { %730 = dma.done.wait [#allocation9], 1024  }
  0x49   :  { %731 = vsyncadd [#allocation9], 4294966272  ;;  %v740_v0 = vmov 0.0   ;;  %vm741_vm0 = vmmov 0   ;;  %v586_v1 = vld [vmem:[#allocation5] sm:$0xff]   ;;  %v587_v2 = vld [vmem:[#allocation5 + $0x8] sm:$0xff]  }
  0x4a   :  { %517 = vmatprep.subr.bf16.mxu0 %v740_v0  ;;  %533 = vmatprep.mubr.msk.bf16.mxu0 %vm741_vm0, %v740_v0  ;;  %v588_v3 = vld [vmem:[#allocation5 + $0x10] sm:$0xff]   ;;  %v589_v4 = vld [vmem:[#allocation5 + $0x18] sm:$0xff]   ;;  %v594_v5 = vld [vmem:[#allocation7] sm:$0xff]  }
  0x4b   :  { %537 = vmatprep.subr.bf16.mxu1 %v740_v0  ;;  %553 = vmatprep.mubr.msk.bf16.mxu1 %vm741_vm0, %v740_v0  ;;  %v590_v6 = vld [vmem:[#allocation5 + $0x20] sm:$0xff]   ;;  %v591_v7 = vld [vmem:[#allocation5 + $0x28] sm:$0xff]   ;;  %v592_v8 = vld [vmem:[#allocation5 + $0x30] sm:$0xff]  }
  0x4c   :  { %518 = vmatpush3.bf16.msra.mxu0 %v586_v1  ;;  %538 = vmatpush3.bf16.msra.mxu1 %v594_v5  ;;  %v593_v9 = vld [vmem:[#allocation5 + $0x38] sm:$0xff]   ;;  %v595_v12 = vld [vmem:[#allocation7 + $0x8] sm:$0xff]   ;;  %v596_v13 = vld [vmem:[#allocation7 + $0x10] sm:$0xff]  }
  0x4d   :  { %519 = vmatprep.subr.bf16.mxu0 %v740_v0  ;;  %539 = vmatprep.subr.bf16.mxu1 %v740_v0  ;;  %v81_v10 = vld [vmem:[#allocation2] sm:$0xff]  ;;  %v598_v15 = vld [vmem:[#allocation7 + $0x20] sm:$0xff]   ;;  %v599_v16 = vld [vmem:[#allocation7 + $0x28] sm:$0xff]  }
  0x4e   :  { %v82_v11 = vpack.c.bf16 %v81_v10, %v81_v10  ;;  %v597_v14 = vld [vmem:[#allocation7 + $0x18] sm:$0xff]   ;;  %v600_v17 = vld [vmem:[#allocation7 + $0x30] sm:$0xff]   ;;  %v602_v19 = vld [vmem:[#allocation8] sm:$0xff]  }
  0x4f   :  { %v601_v18 = vld [vmem:[#allocation7 + $0x38] sm:$0xff]   ;;  %v603_v36 = vld [vmem:[#allocation8 + $0x8] sm:$0xff]   ;;  %v604_v37 = vld [vmem:[#allocation8 + $0x10] sm:$0xff]  }
  0x50   :  { %520 = vmatpush3.bf16.msra.mxu0 %v587_v2  ;;  %540 = vmatpush3.bf16.msra.mxu1 %v595_v12  ;;  %v463_v20 = vld [vmem:[%s893_s2] ss:$0 sm:$0xff]  ;;  %v606_v39 = vld [vmem:[#allocation8 + $0x20] sm:$0xff]   ;;  %v607_v40 = vld [vmem:[#allocation8 + $0x28] sm:$0xff]  }
  0x51   :  { %521 = vmatprep.subr.bf16.mxu0 %v740_v0  ;;  %541 = vmatprep.subr.bf16.mxu1 %v740_v0  ;;  %v605_v38 = vld [vmem:[#allocation8 + $0x18] sm:$0xff]   ;;  %v608_v41 = vld [vmem:[#allocation8 + $0x30] sm:$0xff]  }
  0x52   :  { %v609_v42 = vld [vmem:[#allocation8 + $0x38] sm:$0xff]  }
  0x53   :  { %v472_v43 = vld [vmem:[%s895_s4] ss:$0 sm:$0xff]  ;;  %s742_s4 = smov [#allocation10]  }
  0x54   :  { %522 = vmatpush3.bf16.msra.mxu0 %v588_v3  ;;  %542 = vmatpush3.bf16.msra.mxu1 %v596_v13  ;;  %v481_v59 = vld [vmem:[%s897_s6] ss:$0 sm:$0xff]  ;;  %s452_s28 = sshll.u32 %s742_s4, 4  ;;  %s453_s28 = int_to_ptr.vmem [resolvable:$true] %s452_s28 }
  0x55   :  { %523 = vmatprep.subr.bf16.mxu0 %v740_v0  ;;  %543 = vmatprep.subr.bf16.mxu1 %v740_v0  ;;  %s704_s6 = scalar_lea.vmem %s453_s28, 128  ;;  %p709_p5 = scmp.lt.s32.totalorder %s453_s28, %s453_s28 }
  0x56   :  { %p705_p4 = scmp.ne.s32.totalorder %s453_s28, %s704_s6  ;;  %p710_p6 = scmp.lt.s32.totalorder %s704_s6, %s704_s6 }
  0x58   :  { %524 = vmatpush3.bf16.msra.mxu0 %v589_v4  ;;  %544 = vmatpush3.bf16.msra.mxu1 %v597_v14  ;;  %p711_p7 = por %p710_p6, %p709_p5 }
  0x59   :  { %525 = vmatprep.subr.bf16.mxu0 %v740_v0  ;;  %545 = vmatprep.subr.bf16.mxu1 %v740_v0 }
  0x5a   :  { %p712_p8 = pnand %p711_p7, %p705_p4 }
  0x5c   :  { %526 = vmatpush3.bf16.msra.mxu0 %v590_v6  ;;  %546 = vmatpush3.bf16.msra.mxu1 %v598_v15 }
  0x5d   :  { %527 = vmatprep.subr.bf16.mxu0 %v740_v0  ;;  %547 = vmatprep.subr.bf16.mxu1 %v740_v0 }
  0x60   :  { %528 = vmatpush3.bf16.msra.mxu0 %v591_v7  ;;  %548 = vmatpush3.bf16.msra.mxu1 %v599_v16 }
  0x61   :  { %529 = vmatprep.subr.bf16.mxu0 %v740_v0  ;;  %549 = vmatprep.subr.bf16.mxu1 %v740_v0 }
  0x64   :  { %530 = vmatpush3.bf16.msra.mxu0 %v592_v8  ;;  %550 = vmatpush3.bf16.msra.mxu1 %v600_v17 }
  0x65   :  { %531 = vmatprep.subr.bf16.mxu0 %v740_v0  ;;  %551 = vmatprep.subr.bf16.mxu1 %v740_v0 }
  0x68   :  { %532 = vmatpush3.bf16.msra.mxu0 %v593_v9  ;;  %552 = vmatpush3.bf16.msra.mxu1 %v601_v18 }
  0x69   :  { %557 = vmatprep.subr.bf16.mxu0 %v740_v0 }
  0x6b   :  { %534 = vmatmul.mubr.bf16.vlgmr.msra.gmra.mrb[0].mxu0 %v82_v11 }
  0x6c   :  { %573 = vmatprep.mubr.msk.bf16.mxu0 %vm741_vm0, %v740_v0  ;;  %558 = vmatpush3.bf16.msra.mxu0 %v602_v19 }
  0x6d   :  { %559 = vmatprep.subr.bf16.mxu0 %v740_v0 }
  0x70   :  { %560 = vmatpush3.bf16.msra.mxu0 %v603_v36 }
  0x71   :  { %561 = vmatprep.subr.bf16.mxu0 %v740_v0 }
  0x74   :  { %562 = vmatpush3.bf16.msra.mxu0 %v604_v37 }
  0x75   :  { %563 = vmatprep.subr.bf16.mxu0 %v740_v0 }
  0x78   :  { %564 = vmatpush3.bf16.msra.mxu0 %v605_v38 }
  0x79   :  { %565 = vmatprep.subr.bf16.mxu0 %v740_v0 }
  0x7c   :  { %566 = vmatpush3.bf16.msra.mxu0 %v606_v39 }
  0x7d   :  { %567 = vmatprep.subr.bf16.mxu0 %v740_v0 }
  0x80   :  { %568 = vmatpush3.bf16.msra.mxu0 %v607_v40 }
  0x81   :  { %569 = vmatprep.subr.bf16.mxu0 %v740_v0 }
  0x84   :  { %570 = vmatpush3.bf16.msra.mxu0 %v608_v41 }
  0x85   :  { %571 = vmatprep.subr.bf16.mxu0 %v740_v0 }
  0x88   :  { %572 = vmatpush3.bf16.msra.mxu0 %v609_v42 }
 0x13e   :  { %v188_v21 = vpop.f32.mrb[0].mxu0 }
 0x13f   :  { %v189_v22 = vadd.f32 %v463_v20, %v188_v21  ;;  %v535_v23 = vpop.f32.mrb[1].mxu0 }
 0x140   :  { %v191_v24 = vpop.f32.mrb[2].mxu0 }
 0x141   :  { %v195_v25 = vmul.f32 0.044715, %v189_v22  ;;  %v536_v26 = vpop.f32.mrb[3].mxu0  ;;  %v194_v32 = vmul.f32 0.5, %v189_v22 }
 0x143   :  { %v196_v27 = vmul.f32 %v195_v25, %v189_v22 }
 0x145   :  { %v197_v28 = vmul.f32 %v196_v27, %v189_v22 }
 0x147   :  { %v198_v29 = vadd.f32 %v197_v28, %v189_v22 }
 0x149   :  { %v199_v30 = vmul.f32 0.7978846, %v198_v29 }
 0x14b   :  { %610 = vtanh.f32 %v199_v30 }
 0x155   :  { %v611_v31 = vpop.eup %610 }
 0x156   :  { %v201_v33 = vadd.f32 1.0, %v611_v31 }
 0x158   :  { %v202_v34 = vmul.f32 %v201_v33, %v194_v32 }
 0x15a   :  { %v203_v35 = vpack.c.bf16 %v202_v34, %v202_v34 }
 0x15c   :  { %554 = vmatmul.mubr.bf16.vlgmr.msra.gmra.mrb[0].mxu1 %v203_v35 }
 0x22f   :  { %v309_v44 = vpop.f32.mrb[0].mxu1 }
 0x230   :  { %v310_v45 = vadd.f32 %v472_v43, %v309_v44  ;;  %v555_v46 = vpop.f32.mrb[1].mxu1 }
 0x231   :  { %v312_v47 = vpop.f32.mrb[2].mxu1 }
 0x232   :  { %v316_v48 = vmul.f32 0.044715, %v310_v45  ;;  %v556_v49 = vpop.f32.mrb[3].mxu1  ;;  %v315_v55 = vmul.f32 0.5, %v310_v45 }
 0x234   :  { %v317_v50 = vmul.f32 %v316_v48, %v310_v45 }
 0x236   :  { %v318_v51 = vmul.f32 %v317_v50, %v310_v45 }
 0x238   :  { %v319_v52 = vadd.f32 %v318_v51, %v310_v45 }
 0x23a   :  { %v320_v53 = vmul.f32 0.7978846, %v319_v52 }
 0x23c   :  { %612 = vtanh.f32 %v320_v53 }
 0x246   :  { %v613_v54 = vpop.eup %612 }
 0x247   :  { %v322_v56 = vadd.f32 1.0, %v613_v54 }
 0x249   :  { %v323_v57 = vmul.f32 %v322_v56, %v315_v55 }
 0x24b   :  { %v324_v58 = vpack.c.bf16 %v323_v57, %v323_v57 }
 0x24d   :  { %574 = vmatmul.mubr.bf16.vlgmr.msra.gmra.mrb[4].mxu0 %v324_v58 }
 0x320   :  { %v430_v60 = vpop.f32.mrb[4].mxu0 }
 0x321   :  { %v431_v61 = vadd.f32 %v481_v59, %v430_v60  ;;  %v575_v62 = vpop.f32.mrb[5].mxu0 }
 0x322   :  { %v433_v63 = vpop.f32.mrb[6].mxu0 }
 0x323   :  { %v437_v0 = vmul.f32 0.044715, %v431_v61  ;;  %v576_v1 = vpop.f32.mrb[7].mxu0  ;;  %v436_v7 = vmul.f32 0.5, %v431_v61 }
 0x325   :  { %v438_v2 = vmul.f32 %v437_v0, %v431_v61 }
 0x327   :  { %v439_v3 = vmul.f32 %v438_v2, %v431_v61 }
 0x329   :  { %v440_v4 = vadd.f32 %v439_v3, %v431_v61 }
 0x32b   :  { %v441_v5 = vmul.f32 0.7978846, %v440_v4 }
 0x32d   :  { %614 = vtanh.f32 %v441_v5 }
 0x337   :  { %v615_v6 = vpop.eup %614 }
 0x338   :  { %v443_v8 = vadd.f32 1.0, %v615_v6 }
 0x33a   :  { %v444_v9 = vmul.f32 %v443_v8, %v436_v7 }
 0x33c   :  { %445 = vst [vmem:[#allocation10] sm:$0xff] %v444_v9 }
 0x33d   :  { %715 = shalt.err (!%p712_p8)
}
 0x33e   :  { %s716_s8 = scalar_lea.hbm %s898_s7, 128 }
 0x33f   :  { %p717_p9 = scmp.ne.s32.totalorder %s898_s7, %s716_s8  ;;  %p720_p10 = scmp.lt.u32.totalorder %s716_s8, %s898_s7 }
 0x341   :  { %p722_p11 = pnand %p720_p10, %p717_p9 }
 0x343   :  { %725 = shalt.err (!%p722_p11)
}
 0x344   :  { %455 = dma.vmem_to_hbm [thread:$0]  %s453_s28, 128, %s898_s7, [#allocation4]  }
 0x345   :  { %732 = dma.done.wait [#allocation4], 128  }
 0x346   :  { %733 = vsyncadd [#allocation4], 4294967168 }
 0x347   :  { %459 = vsyncpa [#allocation3], 1 }
 0x348   :  { %460 = vsyncpa [#allocation6], 1 }
 0x349   :  { %461 = vsyncpa [#allocation9], 1 }
 0x34a   :  { %462 = vsyncpa [#allocation4], 1 }

</bundles_post_ra>
